<compile_context>
chip_gen: v6e
topology: v6e:2x2x1
jax: 0.10.0
libtpu: 0.0.40
codegen_flags: <defaults>
</compile_context>

<pallas_src>
import jax
import jax.numpy as jnp
import numpy as np
from jax.experimental import pallas as pl
from jax.experimental.pallas import tpu as pltpu


# --------------- Stage 1: one-shot gather  v_sel[k, :] = v[idx[k], :] -------
def _gather_kernel(idx_ref, v_ref, vsel_ref, acc_ref):
    # idx_ref : VMEM (K, 1) int32  (clamped to [0, N) by the wrapper)
    # v_ref   : VMEM (tn, D) bf16  (current N-chunk of v)
    # vsel_ref: VMEM (K, D)  bf16  (constant block across the grid -> accumulator)
    # acc_ref : VMEM (K, D)  f32   scratch accumulator
    n = pl.program_id(0)
    tn = v_ref.shape[0]
    K = idx_ref.shape[0]

    @pl.when(n == 0)
    def _():
        acc_ref[...] = jnp.zeros_like(acc_ref)

    # One-hot gather on the MXU (exact for 0/1 weights, f32 accumulation):
    #   onehot[k, j] = (n*tn + j == idx[k]);  acc[k, d] += sum_j onehot[k, j] * v[n*tn + j, d]
    col = jax.lax.broadcasted_iota(jnp.int32, (K, tn), 1) + n * tn
    onehot = (col == idx_ref[...]).astype(v_ref.dtype)            # (K, tn) bf16
    acc_ref[...] += jnp.dot(onehot, v_ref[...],
                            preferred_element_type=jnp.float32)

    @pl.when(n == pl.num_programs(0) - 1)
    def _():
        vsel_ref[...] = acc_ref[...].astype(vsel_ref.dtype)       # exact (0/1 weights)


# --------------- Stage 2: plain tiled matmul  c = s @ v_sel -----------------
def _matmul_kernel(s_ref, vsel_ref, o_ref):
    # s_ref   : VMEM (tm, K) bf16
    # vsel_ref: VMEM (K, D)  bf16  (constant index_map -> fetched once)
    # o_ref   : VMEM (tm, D) bf16  (lane-dense, D multiple of 128)
    o_ref[...] = jnp.dot(
        s_ref[...], vsel_ref[...], preferred_element_type=jnp.float32
    ).astype(o_ref.dtype)


# --------------- generation-aware VMEM / tiling helpers ---------------------
def _tpu_vmem_and_multicore():
    """(vmem_capacity_bytes, multi_tensorcore_chip?) with conservative defaults."""
    cap = 64 * 1024 * 1024           # assume the most restrictive (v7x per-TC)
    multicore = True
    try:
        info = pltpu.get_tpu_info()
        cap = int(info.vmem_capacity_bytes)
        # v7x: 2 TensorCores/chip and 64 MiB VMEM per TC; use the small-VMEM
        # signature as a robust proxy for the multi-core case.
        multicore = cap <= 64 * 1024 * 1024
    except Exception:
        pass
    return cap, multicore


def _vmem_budget_bytes(cap):
    # Leave headroom for compiler-internal scratch / pipeline bookkeeping.
    # v7x (64 MiB/TC) -> ~48 MiB; v5e/v6e (128 MiB) -> ~100 MiB.
    return max(32 << 20, min(cap - (16 << 20), 100 << 20))


def _pick_m_tile(M, K, D, budget, prefer_even_blocks):
    def need(tm):
        # double-buffered s tile + double-buffered out tile + v_sel (2 bufs,
        # tiny) + f32 matmul result temporaries + slack.
        return 2 * 2 * tm * K + 2 * 2 * tm * D + 2 * 2 * K * D + 4 * tm * D + (2 << 20)

    cands = [t for t in (1024, 512, 256, 128)
             if t <= M and M % t == 0 and need(t) <= budget]
    if not cands:
        return M                      # single block covering all of M
    if prefer_even_blocks:
        even = [t for t in cands if (M // t) % 2 == 0]
        if even:
            return even[0]            # largest tile giving an even block count
    return cands[0]                   # largest tile that fits (v5e/v6e)


def _pick_n_tile(N, K, D, budget):
    def need(tn):
        # double-buffered v chunk + output (2 bufs) + f32 acc + onehot temp.
        return 2 * 2 * tn * D + 2 * 2 * K * D + 4 * K * D + 2 * K * tn + (2 << 20)

    cands = [t for t in (2048, 1024, 512, 256, 128)
             if t <= N and N % t == 0 and need(t) <= budget]
    return cands[0] if cands else N   # fall back to one full-N block


# --------------- wrapper -----------------------------------------------------
def matmul_idx_bf16(s, v, idx):
    M, K = s.shape
    N, D = v.shape
    assert idx.shape == (K,)

    s = s.astype(jnp.bfloat16)
    v = v.astype(jnp.bfloat16)
    # Clamp indices so a bad idx can never produce an out-of-range access.
    # NOTE: this maps OOB indices to row N-1 instead of faulting like the
    # original custom op would; documented semantic difference (safety net).
    idx2d = jnp.clip(idx.astype(jnp.int32), 0, N - 1).reshape(K, 1)

    cap, multicore = _tpu_vmem_and_multicore()
    budget = _vmem_budget_bytes(cap)

    # ----- Stage 1: v_sel = v[idx]  (one-time one-hot MXU gather) -----
    tn = _pick_n_tile(N, K, D, budget)
    gather_cost = pl.CostEstimate(
        flops=2 * K * N * D,
        transcendentals=0,
        bytes_accessed=2 * (N * D + K * D) + 4 * K,
    )
    v_sel = pl.pallas_call(
        _gather_kernel,
        out_shape=jax.ShapeDtypeStruct((K, D), jnp.bfloat16),
        grid_spec=pltpu.PrefetchScalarGridSpec(
            num_scalar_prefetch=0,
            grid=(N // tn,),
            in_specs=[
                pl.BlockSpec((K, 1), lambda n: (0, 0)),    # idx (tiny, constant)
                pl.BlockSpec((tn, D), lambda n: (n, 0)),   # v streamed over N
            ],
            out_specs=pl.BlockSpec((K, D), lambda n: (0, 0)),
            scratch_shapes=[pltpu.VMEM((K, D), jnp.float32)],
        ),
        compiler_params=pltpu.CompilerParams(
            dimension_semantics=("arbitrary",),            # reduction over N chunks
            vmem_limit_bytes=budget,
        ),
        cost_estimate=gather_cost,
    )(idx2d, v)

    # ----- Stage 2: c = s @ v_sel  (plain tiled bf16 matmul, f32 acc) -----
    tm = _pick_m_tile(M, K, D, budget, prefer_even_blocks=multicore)
    matmul_cost = pl.CostEstimate(
        flops=2 * M * K * D,
        transcendentals=0,
        bytes_accessed=2 * (M * K + K * D + M * D),
    )
    return pl.pallas_call(
        _matmul_kernel,
        out_shape=jax.ShapeDtypeStruct((M, D), jnp.bfloat16),
        grid_spec=pltpu.PrefetchScalarGridSpec(
            num_scalar_prefetch=0,
            grid=(M // tm,),
            in_specs=[
                pl.BlockSpec((tm, K), lambda m: (m, 0)),   # s tile (double-buffered)
                pl.BlockSpec((K, D), lambda m: (0, 0)),    # v_sel (constant, tiny)
            ],
            out_specs=pl.BlockSpec((tm, D), lambda m: (m, 0)),
        ),
        compiler_params=pltpu.CompilerParams(
            dimension_semantics=("parallel",),             # M tiles shard across TCs
            vmem_limit_bytes=budget,
        ),
        cost_estimate=matmul_cost,
    )(s, v_sel)


if __name__ == "__main__":
    key = jax.random.PRNGKey(0)
    k1, k2, k3 = jax.random.split(key, 3)

    # Small shapes consistent with the op: s (M,K), v (N,D), idx (K,) in [0, N)
    M, K, N, D = 128, 128, 256, 128
    s = jax.random.normal(k1, (M, K), dtype=jnp.float32).astype(jnp.bfloat16)
    v = jax.random.normal(k2, (N, D), dtype=jnp.float32).astype(jnp.bfloat16)
    idx = jax.random.randint(k3, (K,), 0, N, dtype=jnp.int32)

    c = matmul_idx_bf16(s, v, idx)
    jax.block_until_ready(c)

    # Pure-JAX reference: gather rows then matmul (f32 accumulation, bf16 out).
    c_ref = jnp.dot(s, v[idx], preferred_element_type=jnp.float32).astype(jnp.bfloat16)
    np.testing.assert_allclose(
        np.asarray(c, dtype=np.float32),
        np.asarray(c_ref, dtype=np.float32),
        rtol=2e-2, atol=2e-2,
    )

    print("KERNEL_OK")
</pallas_src>

<mosaic_0001>
module attributes {stable_mosaic.version = 11 : i64} {
  func.func @_gather_kernel(%arg0: i32, %arg1: memref<128x1xi32, #tpu.memory_space<vmem>>, %arg2: memref<256x128xbf16, #tpu.memory_space<vmem>>, %arg3: memref<128x128xbf16, #tpu.memory_space<vmem>>, %arg4: memref<128x128xf32, #tpu.memory_space<vmem>>) attributes {dimension_semantics = [#tpu.dimension_semantics<arbitrary>], iteration_bounds = array<i64: 1>, scalar_prefetch = 0 : i64, scratch_operands = 1 : i64, tpu.core_type = #tpu.core_type<tc>, window_params = [{pipeline_mode = #tpu.pipeline_mode<synchronous>, transform_indices = @transform_0, window_bounds = array<i64: 128, 1>}, {transform_indices = @transform_1, window_bounds = array<i64: 256, 128>}, {pipeline_mode = #tpu.pipeline_mode<synchronous>, transform_indices = @transform_2, window_bounds = array<i64: 128, 128>}]} {
    %c0_i32 = arith.constant 0 : i32
    %0 = arith.cmpi eq, %arg0, %c0_i32 : i32
    %1 = arith.extui %0 : i1 to i32
    %c0_i32_0 = arith.constant 0 : i32
    %2 = arith.cmpi ne, %1, %c0_i32_0 : i32
    scf.if %2 {
      %cst_10 = arith.constant 0.000000e+00 : f32
      %21 = vector.broadcast %cst_10 : f32 to vector<128x128xf32>
      %c0_11 = arith.constant 0 : index
      %c0_12 = arith.constant 0 : index
      %22 = vector.load %arg4[%c0_11, %c0_12] : memref<128x128xf32, #tpu.memory_space<vmem>>, vector<128x128xf32>
      tpu.vector_store %arg4[%c0_11, %c0_12], %21 {strides = array<i32>} : memref<128x128xf32, #tpu.memory_space<vmem>>, vector<128x128xf32>,
    } else {
    }
    %3 = tpu.iota {dimensions = array<i32: 1>} : vector<128x256xi32>
    %c256_i32 = arith.constant 256 : i32
    %4 = arith.muli %arg0, %c256_i32 : i32
    %5 = vector.broadcast %4 : i32 to vector<128x256xi32>
    %6 = arith.addi %3, %5 : vector<128x256xi32>
    %c0 = arith.constant 0 : index
    %c0_1 = arith.constant 0 : index
    %7 = vector.load %arg1[%c0, %c0_1] : memref<128x1xi32, #tpu.memory_space<vmem>>, vector<128x1xi32>
    %8 = vector.broadcast %7 : vector<128x1xi32> to vector<128x256xi32>
    %9 = arith.cmpi eq, %6, %8 : vector<128x256xi32>
    %10 = arith.extui %9 : vector<128x256xi1> to vector<128x256xi32>
    %11 = arith.sitofp %10 : vector<128x256xi32> to vector<128x256xf32>
    %12 = arith.truncf %11 : vector<128x256xf32> to vector<128x256xbf16>
    %c0_2 = arith.constant 0 : index
    %c0_3 = arith.constant 0 : index
    %13 = vector.load %arg4[%c0_2, %c0_3] : memref<128x128xf32, #tpu.memory_space<vmem>>, vector<128x128xf32>
    %c0_4 = arith.constant 0 : index
    %c0_5 = arith.constant 0 : index
    %14 = vector.load %arg2[%c0_4, %c0_5] : memref<256x128xbf16, #tpu.memory_space<vmem>>, vector<256x128xbf16>
    %cst = arith.constant dense<0.000000e+00> : vector<128x128xf32>
    %15 = tpu.matmul %12, %14, %cst {dimension_numbers = #tpu.dot_dimension_numbers<[1], [0], [0], [1], [0, 0, 1, 1], [], []>} : vector<128x256xbf16>, vector<256x128xbf16>, vector<128x128xf32> -> vector<128x128xf32>
    %16 = arith.addf %13, %15 : vector<128x128xf32>
    %c0_6 = arith.constant 0 : index
    %c0_7 = arith.constant 0 : index
    %17 = vector.load %arg4[%c0_6, %c0_7] : memref<128x128xf32, #tpu.memory_space<vmem>>, vector<128x128xf32>
    tpu.vector_store %arg4[%c0_6, %c0_7], %16 {strides = array<i32>} : memref<128x128xf32, #tpu.memory_space<vmem>>, vector<128x128xf32>,
    %c0_i32_8 = arith.constant 0 : i32
    %18 = arith.cmpi eq, %arg0, %c0_i32_8 : i32
    %19 = arith.extui %18 : i1 to i32
    %c0_i32_9 = arith.constant 0 : i32
    %20 = arith.cmpi ne, %19, %c0_i32_9 : i32
    scf.if %20 {
      %c0_10 = arith.constant 0 : index
      %c0_11 = arith.constant 0 : index
      %21 = vector.load %arg4[%c0_10, %c0_11] : memref<128x128xf32, #tpu.memory_space<vmem>>, vector<128x128xf32>
      %22 = arith.truncf %21 : vector<128x128xf32> to vector<128x128xbf16>
      %c0_12 = arith.constant 0 : index
      %c0_13 = arith.constant 0 : index
      %23 = vector.load %arg3[%c0_12, %c0_13] : memref<128x128xbf16, #tpu.memory_space<vmem>>, vector<128x128xbf16>
      tpu.vector_store %arg3[%c0_12, %c0_13], %22 {strides = array<i32>} : memref<128x128xbf16, #tpu.memory_space<vmem>>, vector<128x128xbf16>,
    } else {
    }
    return
  }
  func.func @transform_0(%arg0: i32) -> (i32, i32) {
    %c0_i32 = arith.constant 0 : i32
    %c0_i32_0 = arith.constant 0 : i32
    %c0_i32_1 = arith.constant 0 : i32
    return %c0_i32, %c0_i32_0 : i32, i32
  }
  func.func @transform_1(%arg0: i32) -> (i32, i32) {
    %c0_i32 = arith.constant 0 : i32
    %c0_i32_0 = arith.constant 0 : i32
    return %arg0, %c0_i32 : i32, i32
  }
  func.func @transform_2(%arg0: i32) -> (i32, i32) {
    %c0_i32 = arith.constant 0 : i32
    %c0_i32_0 = arith.constant 0 : i32
    %c0_i32_1 = arith.constant 0 : i32
    return %c0_i32, %c0_i32_0 : i32, i32
  }
}

</mosaic_0001>

<bundles_post_ra>
// kernel: tpu_custom_call.1
= control target key start
LH: loop header
LB: loop body
LE: loop exit
PB: predicated region body
PF: predicated region fallthrough
CT: control target
= control target key end

     0   :  { %v888_v2 = vmov 0   ;;  %s1066_s0 = inlined_call_operand.vmem [shape: s32[128,1], index: 0, kind: input, shape index: {}]   ;;  %s1067_s1 = inlined_call_operand.vmem [shape: bf16[256,128], index: 1, kind: input, shape index: {}]   ;;  %s1068_s2 = inlined_call_operand.hbm [shape: bf16[128,128], index: 2, kind: output, shape index: {}]  }
   0x1   :  { %v48_v0 = vld [vmem:[%s1066_s0 + $0x40] sm:$0xff]  ;;  %849 = vset.pattern.permute.xlu1 %v888_v2  ;;  %848 = vset.pattern.permute.xlu0 %v888_v2  ;;  %v49_v3 = vld [vmem:[%s1066_s0 + $0x48] sm:$0xff]  ;;  %v43_v5 = vld [vmem:[%s1066_s0 + $0x18] sm:$0xff] }
   0x2   :  { %v40_v1 = vld [vmem:[%s1066_s0] sm:$0xff]  ;;  %81 = vperm.xlu1 %849, %v48_v0   ;;  %v41_v4 = vld [vmem:[%s1066_s0 + $0x8] sm:$0xff]  ;;  %v42_v6 = vld [vmem:[%s1066_s0 + $0x10] sm:$0xff] }
   0x3   :  { %57 = vperm.xlu0 %848, %v40_v1   ;;  %v850_v7 = vld [vmem:[%s1067_s1 + $0x78] sm:$0xff]   ;;  %v852_v9 = vld [vmem:[%s1067_s1 + $0x70] sm:$0xff]   ;;  %v854_v13 = vld [vmem:[%s1067_s1 + $0x68] sm:$0xff]  }
   0x4   :  { %v851_v8 = vld [vmem:[%s1067_s1 + $0x38] sm:$0xff]   ;;  %763 = vmatprep.subr.bf16.mxu0 %v850_v7  ;;  %827 = vmatprep.subr.bf16.mxu1 %v850_v7  ;;  %v853_v11 = vld [vmem:[%s1067_s1 + $0x30] sm:$0xff]   ;;  %v45_v14 = vld [vmem:[%s1066_s0 + $0x28] sm:$0xff] }
   0x5   :  { %v51_v10 = vld [vmem:[%s1066_s0 + $0x58] sm:$0xff]  ;;  %764 = vmatpush3.bf16.msra.mxu0 %v851_v8  ;;  %835 = vmatpush3.bf16.msra.mxu1 %v851_v8  ;;  %v50_v12 = vld [vmem:[%s1066_s0 + $0x50] sm:$0xff]  ;;  %v855_v15 = vld [vmem:[%s1067_s1 + $0x28] sm:$0xff]  }
   0x6   :  { %84 = vperm.xlu1 %849, %v49_v3   ;;  %765 = vmatprep.subr.bf16.mxu0 %v852_v9  ;;  %v44_v16 = vld [vmem:[%s1066_s0 + $0x20] sm:$0xff]  ;;  %v53_v18 = vld [vmem:[%s1066_s0 + $0x68] sm:$0xff]  ;;  %v858_v21 = vld [vmem:[%s1067_s1 + $0x58] sm:$0xff]  }
   0x7   :  { %60 = vperm.xlu0 %848, %v41_v4   ;;  %828 = vmatprep.subr.bf16.mxu1 %v852_v9  ;;  %v856_v17 = vld [vmem:[%s1067_s1 + $0x60] sm:$0xff]   ;;  %v859_v22 = vld [vmem:[%s1067_s1 + $0x18] sm:$0xff]  }
   0x8   :  { %v857_v19 = vld [vmem:[%s1067_s1 + $0x20] sm:$0xff]  }
   0x9   :  { %766 = vmatpush3.bf16.msra.mxu0 %v853_v11  ;;  %836 = vmatpush3.bf16.msra.mxu1 %v853_v11  ;;  %v52_v20 = vld [vmem:[%s1066_s0 + $0x60] sm:$0xff] }
   0xa   :  { %66 = vperm.xlu1 %849, %v43_v5   ;;  %767 = vmatprep.subr.bf16.mxu0 %v854_v13 }
   0xb   :  { %63 = vperm.xlu0 %848, %v42_v6   ;;  %829 = vmatprep.subr.bf16.mxu1 %v854_v13 }
   0xd   :  { %768 = vmatpush3.bf16.msra.mxu0 %v855_v15  ;;  %837 = vmatpush3.bf16.msra.mxu1 %v855_v15 }
   0xe   :  { %90 = vperm.xlu1 %849, %v51_v10   ;;  %769 = vmatprep.subr.bf16.mxu0 %v856_v17 }
   0xf   :  { %87 = vperm.xlu0 %848, %v50_v12   ;;  %830 = vmatprep.subr.bf16.mxu1 %v856_v17 }
  0x11   :  { %770 = vmatpush3.bf16.msra.mxu0 %v857_v19  ;;  %838 = vmatpush3.bf16.msra.mxu1 %v857_v19 }
  0x12   :  { %72 = vperm.xlu1 %849, %v45_v14  }
  0x13   :  { %69 = vperm.xlu0 %848, %v44_v16  }
  0x14   :  { %7 = vsyncpa [#allocation4], 0  ;;  %v47_v23 = vld [vmem:[%s1066_s0 + $0x38] sm:$0xff]  ;;  %v46_v24 = vld [vmem:[%s1066_s0 + $0x30] sm:$0xff]  ;;  %771 = vmatprep.subr.bf16.mxu0 %v858_v21  ;;  %831 = vmatprep.subr.bf16.mxu1 %v858_v21  ;;  %v33_v33 = vlaneseq  ;;  %v889_v43 = vmov 1.0|1.0  }
  0x15   :  { %v860_v25 = vld [vmem:[%s1067_s1 + $0x50] sm:$0xff]   ;;  %772 = vmatpush3.bf16.msra.mxu0 %v859_v22  ;;  %839 = vmatpush3.bf16.msra.mxu1 %v859_v22  ;;  %v55_v27 = vld [vmem:[%s1066_s0 + $0x78] sm:$0xff]  ;;  %v862_v29 = vld [vmem:[%s1067_s1 + $0x48] sm:$0xff]  }
  0x16   :  { %96 = vperm.xlu1 %849, %v53_v18   ;;  %v861_v26 = vld [vmem:[%s1067_s1 + $0x10] sm:$0xff]   ;;  %773 = vmatprep.subr.bf16.mxu0 %v860_v25  ;;  %v863_v30 = vld [vmem:[%s1067_s1 + $0x8] sm:$0xff]   ;;  %v864_v31 = vld [vmem:[%s1067_s1 + $0x40] sm:$0xff]   ;;  %v1004_v34 = vand.u32 127, %v33_v33 }
  0x17   :  { %93 = vperm.xlu0 %848, %v52_v20   ;;  %v54_v28 = vld [vmem:[%s1066_s0 + $0x70] sm:$0xff]  ;;  %832 = vmatprep.subr.bf16.mxu1 %v860_v25  ;;  %v865_v32 = vld [vmem:[%s1067_s1] sm:$0xff]   ;;  %s890_s1 = smov [#allocation3]  }
  0x18   :  { %v1007_v37 = vadd.s32 128, %v1004_v34  ;;  %s593_s16 = sshll.u32 %s890_s1, 4  ;;  %s594_s16 = int_to_ptr.vmem [resolvable:$true] %s593_s16 }
  0x19   :  { %774 = vmatpush3.bf16.msra.mxu0 %v861_v26  ;;  %840 = vmatpush3.bf16.msra.mxu1 %v861_v26  ;;  %s866_s17 = scalar_lea.vmem %s594_s16, 1024  ;;  %p871_p1 = scmp.lt.s32.totalorder %s594_s16, %s594_s16 }
  0x1a   :  { %78 = vperm.xlu1 %849, %v47_v23   ;;  %775 = vmatprep.subr.bf16.mxu0 %v862_v29  ;;  %p867_p0 = scmp.ne.s32.totalorder %s594_s16, %s866_s17  ;;  %p872_p2 = scmp.lt.s32.totalorder %s866_s17, %s866_s17 }
  0x1b   :  { %75 = vperm.xlu0 %848, %v46_v24   ;;  %833 = vmatprep.subr.bf16.mxu1 %v862_v29 }
  0x1c   :  { %p873_p3 = por %p872_p2, %p871_p1 }
  0x1d   :  { %776 = vmatpush3.bf16.msra.mxu0 %v863_v30  ;;  %841 = vmatpush3.bf16.msra.mxu1 %v863_v30 }
  0x1e   :  { %102 = vperm.xlu1 %849, %v55_v27   ;;  %777 = vmatprep.subr.bf16.mxu0 %v864_v31  ;;  %p874_p4 = pnand %p873_p3, %p867_p0 }
  0x1f   :  { %99 = vperm.xlu0 %848, %v54_v28   ;;  %834 = vmatprep.subr.bf16.mxu1 %v864_v31 }
  0x21   :  { %778 = vmatpush3.bf16.msra.mxu0 %v865_v32  ;;  %842 = vmatpush3.bf16.msra.mxu1 %v865_v32 }
  0x7d   :  { %v82_v35 = vpop.permute.xlu1 %81 }
  0x7e   :  { %v58_v36 = vpop.permute.xlu0 %57  ;;  %vm120_vm0 = vcmp.eq.s32.totalorder %v1004_v34, %v82_v35  ;;  %vm121_vm10 = vcmp.eq.s32.totalorder %v1007_v37, %v82_v35 }
  0x7f   :  { %vm104_vm4 = vcmp.eq.s32.totalorder %v1004_v34, %v58_v36  ;;  %vm105_vm8 = vcmp.eq.s32.totalorder %v1007_v37, %v58_v36 }
  0x81   :  { %v85_v38 = vpop.permute.xlu1 %84 }
  0x82   :  { %v61_v39 = vpop.permute.xlu0 %60  ;;  %vm122_vm1 = vcmp.eq.s32.totalorder %v1004_v34, %v85_v38  ;;  %vm123_vm6 = vcmp.eq.s32.totalorder %v1007_v37, %v85_v38 }
  0x83   :  { %vm106_vm2 = vcmp.eq.s32.totalorder %v1004_v34, %v61_v39  ;;  %vm107_vm3 = vcmp.eq.s32.totalorder %v1007_v37, %v61_v39  ;;  %vm1014_vm5 = vmpackc.low %vm122_vm1, %vm120_vm0 }
  0x84   :  { %vm654_vm7 = vmpackc.low %vm106_vm2, %vm104_vm4 }
  0x85   :  { %vm652_vm9 = vmpackc.low %vm107_vm3, %vm105_vm8  ;;  %v67_v41 = vpop.permute.xlu1 %66 }
  0x86   :  { %v64_v42 = vpop.permute.xlu0 %63  ;;  %653 = vmatprep.mubr.msk.bf16.mxu0 %vm652_vm9, %v889_v43  ;;  %vm668_vm11 = vmpackc.low %vm123_vm6, %vm121_vm10  ;;  %vm111_vm12 = vcmp.eq.s32.totalorder %v1007_v37, %v67_v41  ;;  %vm110_vm3 = vcmp.eq.s32.totalorder %v1004_v34, %v67_v41 }
  0x87   :  { %vm109_vm13 = vcmp.eq.s32.totalorder %v1007_v37, %v64_v42  ;;  %669 = vmatprep.mubr.msk.bf16.mxu1 %vm668_vm11, %v889_v43  ;;  %655 = vmatmul.mubr.msk.bf16.vlgmr.msra.gmra.mxu0 %vm654_vm7, %v889_v43  ;;  %vm108_vm4 = vcmp.eq.s32.totalorder %v1004_v34, %v64_v42 }
  0x88   :  { %vm656_vm14 = vmpackc.low %vm111_vm12, %vm109_vm13  ;;  %671 = vmatmul.mubr.msk.bf16.vlgmr.msra.gmra.mxu1 %vm1014_vm5, %v889_v43 }
  0x89   :  { %657 = vmatprep.mubr.msk.bf16.mxu0 %vm656_vm14, %v889_v43  ;;  %v91_v44 = vpop.permute.xlu1 %90  ;;  %vm658_vm7 = vmpackc.low %vm110_vm3, %vm108_vm4 }
  0x8a   :  { %v88_v45 = vpop.permute.xlu0 %87  ;;  %vm126_vm15 = vcmp.eq.s32.totalorder %v1004_v34, %v91_v44  ;;  %vm127_vm0 = vcmp.eq.s32.totalorder %v1007_v37, %v91_v44 }
  0x8b   :  { %vm124_vm1 = vcmp.eq.s32.totalorder %v1004_v34, %v88_v45  ;;  %vm125_vm2 = vcmp.eq.s32.totalorder %v1007_v37, %v88_v45 }
  0x8c   :  { %vm672_vm6 = vmpackc.low %vm127_vm0, %vm125_vm2 }
  0x8d   :  { %673 = vmatprep.mubr.msk.bf16.mxu1 %vm672_vm6, %v889_v43  ;;  %vm674_vm5 = vmpackc.low %vm126_vm15, %vm124_vm1  ;;  %v73_v46 = vpop.permute.xlu1 %72 }
  0x8e   :  { %v70_v47 = vpop.permute.xlu0 %69  ;;  %vm115_vm8 = vcmp.eq.s32.totalorder %v1007_v37, %v73_v46  ;;  %vm114_vm15 = vcmp.eq.s32.totalorder %v1004_v34, %v73_v46 }
  0x8f   :  { %vm113_vm9 = vcmp.eq.s32.totalorder %v1007_v37, %v70_v47  ;;  %659 = vmatmul.mubr.msk.bf16.gmra.mxu0 %vm658_vm7, %v889_v43  ;;  %vm112_vm0 = vcmp.eq.s32.totalorder %v1004_v34, %v70_v47 }
  0x90   :  { %vm660_vm10 = vmpackc.low %vm115_vm8, %vm113_vm9  ;;  %675 = vmatmul.mubr.msk.bf16.gmra.mxu1 %vm674_vm5, %v889_v43 }
  0x91   :  { %661 = vmatprep.mubr.msk.bf16.mxu0 %vm660_vm10, %v889_v43  ;;  %v97_v48 = vpop.permute.xlu1 %96  ;;  %vm662_vm3 = vmpackc.low %vm114_vm15, %vm112_vm0 }
  0x92   :  { %v94_v49 = vpop.permute.xlu0 %93  ;;  %vm130_vm11 = vcmp.eq.s32.totalorder %v1004_v34, %v97_v48  ;;  %vm131_vm12 = vcmp.eq.s32.totalorder %v1007_v37, %v97_v48 }
  0x93   :  { %vm128_vm13 = vcmp.eq.s32.totalorder %v1004_v34, %v94_v49  ;;  %vm129_vm14 = vcmp.eq.s32.totalorder %v1007_v37, %v94_v49 }
  0x94   :  { %vm676_vm1 = vmpackc.low %vm131_vm12, %vm129_vm14 }
  0x95   :  { %677 = vmatprep.mubr.msk.bf16.mxu1 %vm676_vm1, %v889_v43  ;;  %vm678_vm2 = vmpackc.low %vm130_vm11, %vm128_vm13  ;;  %v79_v50 = vpop.permute.xlu1 %78 }
  0x96   :  { %v76_v51 = vpop.permute.xlu0 %75  ;;  %vm119_vm4 = vcmp.eq.s32.totalorder %v1007_v37, %v79_v50  ;;  %vm118_vm11 = vcmp.eq.s32.totalorder %v1004_v34, %v79_v50 }
  0x97   :  { %vm117_vm6 = vcmp.eq.s32.totalorder %v1007_v37, %v76_v51  ;;  %663 = vmatmul.mubr.msk.bf16.gmra.mxu0 %vm662_vm3, %v889_v43  ;;  %vm116_vm12 = vcmp.eq.s32.totalorder %v1004_v34, %v76_v51 }
  0x98   :  { %vm664_vm5 = vmpackc.low %vm119_vm4, %vm117_vm6  ;;  %679 = vmatmul.mubr.msk.bf16.gmra.mxu1 %vm678_vm2, %v889_v43 }
  0x99   :  { %665 = vmatprep.mubr.msk.bf16.mxu0 %vm664_vm5, %v889_v43  ;;  %v103_v52 = vpop.permute.xlu1 %102  ;;  %vm666_vm15 = vmpackc.low %vm118_vm11, %vm116_vm12 }
  0x9a   :  { %v100_v53 = vpop.permute.xlu0 %99  ;;  %vm134_vm7 = vcmp.eq.s32.totalorder %v1004_v34, %v103_v52  ;;  %vm135_vm8 = vcmp.eq.s32.totalorder %v1007_v37, %v103_v52 }
  0x9b   :  { %vm132_vm9 = vcmp.eq.s32.totalorder %v1004_v34, %v100_v53  ;;  %vm133_vm10 = vcmp.eq.s32.totalorder %v1007_v37, %v100_v53 }
  0x9c   :  { %vm680_vm13 = vmpackc.low %vm135_vm8, %vm133_vm10 }
  0x9d   :  { %681 = vmatprep.mubr.msk.bf16.mxu1 %vm680_vm13, %v889_v43  ;;  %vm682_vm14 = vmpackc.low %vm134_vm7, %vm132_vm9 }
  0x9f   :  { %667 = vmatmul.mubr.msk.bf16.gmra.mxu0 %vm666_vm15, %v889_v43 }
  0xa0   :  { %683 = vmatmul.mubr.msk.bf16.gmra.mxu1 %vm682_vm14, %v889_v43 }
 0x147   :  { %v779_v54 = vpop.f32.mrf.mxu0 }
 0x148   :  { %v803_v55 = vpop.f32.mrf.mxu1 }
 0x149   :  { %v780_v56 = vpop.f32.mrf.mxu0 }
 0x14a   :  { %v804_v57 = vpop.f32.mrf.mxu1  ;;  %v781_v61 = vadd.f32 %v780_v56, %v779_v54 }
 0x14b   :  { %v782_v58 = vpop.f32.mrf.mxu0  ;;  %v805_v0 = vadd.f32 %v804_v57, %v803_v55 }
 0x14c   :  { %v806_v59 = vpop.f32.mrf.mxu1 }
 0x14d   :  { %v783_v60 = vpop.f32.mrf.mxu0 }
 0x14e   :  { %v784_v62 = vadd.f32 %v783_v60, %v782_v58  ;;  %v807_v63 = vpop.f32.mrf.mxu1 }
 0x14f   :  { %v808_v1 = vadd.f32 %v807_v63, %v806_v59  ;;  %v785_v2 = vpop.f32.mrf.mxu0 }
 0x150   :  { %v719_v3 = vpack.c.bf16 %v784_v62, %v781_v61  ;;  %v809_v4 = vpop.f32.mrf.mxu1 }
 0x151   :  { %v739_v5 = vpack.c.bf16 %v808_v1, %v805_v0  ;;  %v786_v6 = vpop.f32.mrf.mxu0 }
 0x152   :  { %720 = vst [vmem:[#allocation3] sm:$0xff] %v719_v3   ;;  %v810_v7 = vpop.f32.mrf.mxu1  ;;  %v787_v11 = vadd.f32 %v786_v6, %v785_v2 }
 0x153   :  { %759 = vst [vmem:[#allocation3 + $0x20] sm:$0xff] %v739_v5   ;;  %v788_v8 = vpop.f32.mrf.mxu0  ;;  %v811_v14 = vadd.f32 %v810_v7, %v809_v4 }
 0x154   :  { %v812_v9 = vpop.f32.mrf.mxu1 }
 0x155   :  { %v789_v10 = vpop.f32.mrf.mxu0 }
 0x156   :  { %v790_v12 = vadd.f32 %v789_v10, %v788_v8  ;;  %v813_v13 = vpop.f32.mrf.mxu1 }
 0x157   :  { %v814_v15 = vadd.f32 %v813_v13, %v812_v9  ;;  %v791_v16 = vpop.f32.mrf.mxu0 }
 0x158   :  { %v724_v17 = vpack.c.bf16 %v790_v12, %v787_v11  ;;  %v815_v18 = vpop.f32.mrf.mxu1 }
 0x159   :  { %v744_v19 = vpack.c.bf16 %v814_v15, %v811_v14  ;;  %v792_v20 = vpop.f32.mrf.mxu0 }
 0x15a   :  { %756 = vst [vmem:[#allocation3 + $0x8] sm:$0xff] %v724_v17   ;;  %v816_v21 = vpop.f32.mrf.mxu1  ;;  %v793_v25 = vadd.f32 %v792_v20, %v791_v16 }
 0x15b   :  { %760 = vst [vmem:[#allocation3 + $0x28] sm:$0xff] %v744_v19   ;;  %v794_v22 = vpop.f32.mrf.mxu0  ;;  %v817_v28 = vadd.f32 %v816_v21, %v815_v18 }
 0x15c   :  { %v818_v23 = vpop.f32.mrf.mxu1 }
 0x15d   :  { %v795_v24 = vpop.f32.mrf.mxu0 }
 0x15e   :  { %v796_v26 = vadd.f32 %v795_v24, %v794_v22  ;;  %v819_v27 = vpop.f32.mrf.mxu1 }
 0x15f   :  { %v820_v29 = vadd.f32 %v819_v27, %v818_v23  ;;  %v797_v30 = vpop.f32.mrf.mxu0 }
 0x160   :  { %v729_v31 = vpack.c.bf16 %v796_v26, %v793_v25  ;;  %v821_v32 = vpop.f32.mrf.mxu1 }
 0x161   :  { %v749_v33 = vpack.c.bf16 %v820_v29, %v817_v28  ;;  %v798_v34 = vpop.f32.mrf.mxu0 }
 0x162   :  { %757 = vst [vmem:[#allocation3 + $0x10] sm:$0xff] %v729_v31   ;;  %v822_v35 = vpop.f32.mrf.mxu1  ;;  %v799_v39 = vadd.f32 %v798_v34, %v797_v30 }
 0x163   :  { %761 = vst [vmem:[#allocation3 + $0x30] sm:$0xff] %v749_v33   ;;  %v800_v36 = vpop.f32.mrf.mxu0  ;;  %v823_v42 = vadd.f32 %v822_v35, %v821_v32 }
 0x164   :  { %v824_v37 = vpop.f32.mrf.mxu1 }
 0x165   :  { %v801_v38 = vpop.f32.mrf.mxu0 }
 0x166   :  { %v802_v40 = vadd.f32 %v801_v38, %v800_v36  ;;  %v825_v41 = vpop.f32.mrf.mxu1 }
 0x167   :  { %v826_v43 = vadd.f32 %v825_v41, %v824_v37 }
 0x168   :  { %v734_v44 = vpack.c.bf16 %v802_v40, %v799_v39 }
 0x169   :  { %v754_v45 = vpack.c.bf16 %v826_v43, %v823_v42 }
 0x16a   :  { %758 = vst [vmem:[#allocation3 + $0x18] sm:$0xff] %v734_v44  }
 0x16b   :  { %762 = vst [vmem:[#allocation3 + $0x38] sm:$0xff] %v754_v45  }
 0x16c   :  { %877 = shalt.err (!%p874_p4)
}
 0x16d   :  { %s891_s18 = smov 64   ;;  %s892_s19 = smov 4  }
 0x16e   :  { %599 = dma.vmem_to_hbm [thread:$0]  %s594_s16, 1024, %s1068_s2, [#allocation4], %s891_s18, %s891_s18, %s892_s19  }
 0x16f   :  { %886 = dma.done.wait [#allocation4], 1024  }
 0x170   :  { %887 = vsyncadd [#allocation4], 4294966272 }
 0x171   :  { %603 = vsyncpa [#allocation4], 1 }

</bundles_post_ra>
